<compile_context>
chip_gen: v7x
topology: tpu7x:2x2x1
jax: 0.10.0
libtpu: 0.0.40
codegen_flags: <defaults>
</compile_context>

<pallas_src>
import jax
import jax.numpy as jnp
from jax import lax
from jax.experimental import pallas as pl
from jax.experimental.pallas import tpu as pltpu


# Stand-in for the PyTorch global CONFIG
class CONFIG:
    latent_space = 32


_MAX_TK = 2048            # upper bound on the K (dict_length) tile -- sweepable
_MAX_TB = 256             # batch tile when the batch is large
_DOT_DN = (((1,), (1,)), ((), ()))   # contract last axis of x with last axis of W


def _linear_kernel(x_ref, w_ref, o_ref):
    """y[B, L] += x[B, tk] . W[L, tk]^T ; output block is resident over the K axis."""
    k = pl.program_id(1)

    @pl.when(k == 0)
    def _():
        o_ref[...] = jnp.zeros_like(o_ref)

    x_tile = x_ref[...].astype(w_ref.dtype)
    o_ref[...] += lax.dot_general(
        x_tile, w_ref[...], _DOT_DN, preferred_element_type=jnp.float32
    )


def _fused_kernel(x_ref, wi_ref, wt_ref, oi_ref, ot_ref):
    """Both projections in one pass: x is streamed from HBM once."""
    k = pl.program_id(1)

    @pl.when(k == 0)
    def _():
        oi_ref[...] = jnp.zeros_like(oi_ref)
        ot_ref[...] = jnp.zeros_like(ot_ref)

    x_tile = x_ref[...]
    oi_ref[...] += lax.dot_general(
        x_tile.astype(wi_ref.dtype), wi_ref[...], _DOT_DN,
        preferred_element_type=jnp.float32)
    ot_ref[...] += lax.dot_general(
        x_tile.astype(wt_ref.dtype), wt_ref[...], _DOT_DN,
        preferred_element_type=jnp.float32)


def _choose_tiles(B, K):
    tk = K if K <= _MAX_TK else _MAX_TK
    kt = pl.cdiv(K, tk)
    k_pad = kt * tk
    if B > _MAX_TB and B % _MAX_TB == 0:
        tb = _MAX_TB
    else:
        tb = B                         # small batches stay a single (full-dim) block
    bt = B // tb
    return tb, bt, tk, kt, k_pad


def _pad_last(a, k_pad):
    k = a.shape[-1]
    if k == k_pad:
        return a
    return jnp.pad(a, ((0, 0), (0, k_pad - k)))   # zero-pad K: exact for a matmul


@jax.jit
def word2vec_forward(x, weight):
    """y = x @ weight.T  (nn.Linear with bias=False).

    x:      (B, dict_length)                       float32
    weight: (latent_space, dict_length)            float32 or bfloat16 (PyTorch layout)
    returns (B, latent_space)                      float32
    """
    B, K = x.shape
    L, Kw = weight.shape
    assert K == Kw, "dict_length mismatch"

    tb, bt, tk, kt, k_pad = _choose_tiles(B, K)
    x_p = _pad_last(x, k_pad)
    w_p = _pad_last(weight, k_pad)

    return pl.pallas_call(
        _linear_kernel,
        out_shape=jax.ShapeDtypeStruct((B, L), jnp.float32),
        grid_spec=pltpu.PrefetchScalarGridSpec(
            num_scalar_prefetch=0,
            grid=(bt, kt),
            in_specs=[
                pl.BlockSpec((tb, tk), lambda b, k: (b, k)),   # x: stream over K
                pl.BlockSpec((L, tk), lambda b, k: (0, k)),    # W: native (L, K), lane-dense
            ],
            out_specs=pl.BlockSpec((tb, L), lambda b, k: (b, 0)),  # resident accumulator
        ),
        compiler_params=pltpu.CompilerParams(
            dimension_semantics=("parallel", "arbitrary"),
            vmem_limit_bytes=32 * 1024 * 1024,   # covers 2x-buffered tiles on v5e/v6e/v7x
        ),
    )(x_p, w_p)


@jax.jit
def word2vec_forward_both(x, w_inputs, w_targets):
    """Fused: (x @ w_inputs.T, x @ w_targets.T) with x streamed from HBM once."""
    B, K = x.shape
    L, Kw = w_inputs.shape
    assert K == Kw and w_targets.shape == w_inputs.shape

    tb, bt, tk, kt, k_pad = _choose_tiles(B, K)
    x_p = _pad_last(x, k_pad)
    wi_p = _pad_last(w_inputs, k_pad)
    wt_p = _pad_last(w_targets, k_pad)

    out_block = pl.BlockSpec((tb, L), lambda b, k: (b, 0))
    return pl.pallas_call(
        _fused_kernel,
        out_shape=(jax.ShapeDtypeStruct((B, L), jnp.float32),
                   jax.ShapeDtypeStruct((B, L), jnp.float32)),
        grid_spec=pltpu.PrefetchScalarGridSpec(
            num_scalar_prefetch=0,
            grid=(bt, kt),
            in_specs=[
                pl.BlockSpec((tb, tk), lambda b, k: (b, k)),
                pl.BlockSpec((L, tk), lambda b, k: (0, k)),
                pl.BlockSpec((L, tk), lambda b, k: (0, k)),
            ],
            out_specs=[out_block, out_block],
        ),
        compiler_params=pltpu.CompilerParams(
            dimension_semantics=("parallel", "arbitrary"),
            vmem_limit_bytes=32 * 1024 * 1024,
        ),
    )(x_p, wi_p, wt_p)


class Word2VecPallas:
    """JAX/Pallas port of the PyTorch Word2Vec module (forward paths only)."""

    def __init__(self, dict_length, key, weight_dtype=jnp.float32):
        k_in, k_tgt = jax.random.split(key)
        # Deterministic init mimicking nn.Linear's uniform(-1/sqrt(fan_in), 1/sqrt(fan_in))
        bound = 1.0 / (dict_length ** 0.5)

        def init(k):
            w = jax.random.uniform(
                k, (CONFIG.latent_space, dict_length),
                minval=-bound, maxval=bound, dtype=jnp.float32)
            return w.astype(weight_dtype)   # bf16 storage halves streamed-W HBM bytes

        self.encode_inputs_w = init(k_in)
        self.encode_targets_w = init(k_tgt)

    def forward(self, x):
        return word2vec_forward(x, self.encode_inputs_w)

    def forward_targets(self, x):
        return word2vec_forward(x, self.encode_targets_w)

    def forward_both(self, x):
        # Fused call: halves x traffic and launch/pipeline overhead vs two calls.
        return word2vec_forward_both(x, self.encode_inputs_w, self.encode_targets_w)

    # TODO(synk): get_state() exposes .grad fields — gradients are a training-time
    # concern with no forward-kernel equivalent; weights are returned as-is.
    def get_state(self):
        return {
            "weights/inputs": self.encode_inputs_w,
            "weights/target": self.encode_targets_w,
        }


if __name__ == "__main__":
    key = jax.random.PRNGKey(0)
    k_model, k_x = jax.random.split(key)

    dict_length = 256   # vocabulary size (K)
    batch = 8           # rows of one-hot / bag-of-words inputs

    model = Word2VecPallas(dict_length, k_model)
    x = jax.random.normal(k_x, (batch, dict_length), dtype=jnp.float32)

    y = model.forward(x)
    y_t = model.forward_targets(x)
    y_f_in, y_f_tgt = model.forward_both(x)
    jax.block_until_ready((y, y_t, y_f_in, y_f_tgt))

    # Correctness check against plain-JAX reference of nn.Linear(bias=False)
    y_ref = x @ model.encode_inputs_w.T
    yt_ref = x @ model.encode_targets_w.T
    assert y.shape == (batch, CONFIG.latent_space)
    assert jnp.allclose(y, y_ref, atol=1e-4, rtol=1e-4)
    assert jnp.allclose(y_t, yt_ref, atol=1e-4, rtol=1e-4)
    assert jnp.allclose(y_f_in, y, atol=1e-4, rtol=1e-4)
    assert jnp.allclose(y_f_tgt, y_t, atol=1e-4, rtol=1e-4)

    # bf16-weight variant: ~2x less weight HBM traffic (the dominant bytes); MXU
    # accumulation stays f32, so only a modest tolerance relaxation is needed.
    model_bf16 = Word2VecPallas(dict_length, k_model, weight_dtype=jnp.bfloat16)
    y_bf = model_bf16.forward(x)
    jax.block_until_ready(y_bf)
    y_bf_ref = x @ model_bf16.encode_inputs_w.astype(jnp.float32).T
    assert jnp.allclose(y_bf, y_bf_ref, atol=5e-2, rtol=5e-2)

    print("KERNEL_OK")
</pallas_src>

<mosaic_0001>
module attributes {stable_mosaic.version = 11 : i64} {
  func.func @_linear_kernel(%arg0: i32, %arg1: i32, %arg2: memref<8x256xf32, #tpu.memory_space<vmem>>, %arg3: memref<32x256xf32, #tpu.memory_space<vmem>>, %arg4: memref<8x32xf32, #tpu.memory_space<vmem>>) attributes {dimension_semantics = [#tpu.dimension_semantics<parallel>, #tpu.dimension_semantics<arbitrary>], iteration_bounds = array<i64: 1, 1>, scalar_prefetch = 0 : i64, scratch_operands = 0 : i64, tpu.core_type = #tpu.core_type<tc>, window_params = [{transform_indices = @transform_0, window_bounds = array<i64: 8, 256>}, {transform_indices = @transform_1, window_bounds = array<i64: 32, 256>}, {transform_indices = @transform_2, window_bounds = array<i64: 8, 32>}]} {
    %c0_i32 = arith.constant 0 : i32
    %0 = arith.cmpi eq, %arg1, %c0_i32 : i32
    %1 = arith.extui %0 : i1 to i32
    %c0_i32_0 = arith.constant 0 : i32
    %2 = arith.cmpi ne, %1, %c0_i32_0 : i32
    scf.if %2 {
      %cst_8 = arith.constant 0.000000e+00 : f32
      %9 = vector.broadcast %cst_8 : f32 to vector<8x32xf32>
      %c0_9 = arith.constant 0 : index
      %c0_10 = arith.constant 0 : index
      %10 = vector.load %arg4[%c0_9, %c0_10] : memref<8x32xf32, #tpu.memory_space<vmem>>, vector<8x32xf32>
      tpu.vector_store %arg4[%c0_9, %c0_10], %9 {strides = array<i32>} : memref<8x32xf32, #tpu.memory_space<vmem>>, vector<8x32xf32>,
    } else {
    }
    %c0 = arith.constant 0 : index
    %c0_1 = arith.constant 0 : index
    %3 = vector.load %arg2[%c0, %c0_1] : memref<8x256xf32, #tpu.memory_space<vmem>>, vector<8x256xf32>
    %c0_2 = arith.constant 0 : index
    %c0_3 = arith.constant 0 : index
    %4 = vector.load %arg4[%c0_2, %c0_3] : memref<8x32xf32, #tpu.memory_space<vmem>>, vector<8x32xf32>
    %c0_4 = arith.constant 0 : index
    %c0_5 = arith.constant 0 : index
    %5 = vector.load %arg3[%c0_4, %c0_5] : memref<32x256xf32, #tpu.memory_space<vmem>>, vector<32x256xf32>
    %cst = arith.constant dense<0.000000e+00> : vector<8x32xf32>
    %6 = tpu.matmul %3, %5, %cst {dimension_numbers = #tpu.dot_dimension_numbers<[1], [1], [0], [0], [0, 0, 1, 0], [], []>} : vector<8x256xf32>, vector<32x256xf32>, vector<8x32xf32> -> vector<8x32xf32>
    %7 = arith.addf %4, %6 : vector<8x32xf32>
    %c0_6 = arith.constant 0 : index
    %c0_7 = arith.constant 0 : index
    %8 = vector.load %arg4[%c0_6, %c0_7] : memref<8x32xf32, #tpu.memory_space<vmem>>, vector<8x32xf32>
    tpu.vector_store %arg4[%c0_6, %c0_7], %7 {strides = array<i32>} : memref<8x32xf32, #tpu.memory_space<vmem>>, vector<8x32xf32>,
    return
  }
  func.func @transform_0(%arg0: i32, %arg1: i32) -> (i32, i32) {
    %c0_i32 = arith.constant 0 : i32
    return %arg0, %arg1 : i32, i32
  }
  func.func @transform_1(%arg0: i32, %arg1: i32) -> (i32, i32) {
    %c0_i32 = arith.constant 0 : i32
    %c0_i32_0 = arith.constant 0 : i32
    return %c0_i32, %arg1 : i32, i32
  }
  func.func @transform_2(%arg0: i32, %arg1: i32) -> (i32, i32) {
    %c0_i32 = arith.constant 0 : i32
    %c0_i32_0 = arith.constant 0 : i32
    return %arg0, %c0_i32 : i32, i32
  }
}

</mosaic_0001>

<bundles_post_ra>
// kernel: word2vec_forward.1
= control target key start
LH: loop header
LB: loop body
LE: loop exit
PB: predicated region body
PF: predicated region fallthrough
CT: control target
= control target key end

     0   :  { %7 = vsyncpa [#allocation3], 0  ;;  %s296_s0 = inlined_call_operand.hbm [shape: f32[8,256], index: 0, kind: input, shape index: {}]   ;;  %s297_s1 = inlined_call_operand.hbm [shape: f32[32,256], index: 1, kind: input, shape index: {}]   ;;  %s298_s2 = inlined_call_operand.hbm [shape: f32[8,32], index: 2, kind: output, shape index: {}]  }
   0x1   :  { %8 = vsyncpa [#allocation6], 0 }
   0x2   :  { %9 = vsyncpa [#allocation4], 0  ;;  %s230_s9 = smov [#allocation2]   ;;  %s231_s11 = smov [#allocation5]  }
   0x3   :  { %s16_s10 = sshll.u32 %s230_s9, 4  ;;  %s25_s12 = sshll.u32 %s231_s11, 4  ;;  %s17_s10 = int_to_ptr.vmem [resolvable:$true] %s16_s10  ;;  %s251_s12 = int_to_ptr.vmem [resolvable:$true] %s25_s12 }
   0x4   :  { %s158_s15 = scalar_lea.hbm %s296_s0, 256 }
   0x5   :  { %p159_p0 = scmp.ne.s32.totalorder %s296_s0, %s158_s15  ;;  %p162_p1 = scmp.lt.u32.totalorder %s158_s15, %s296_s0 }
   0x7   :  { %p164_p2 = pnand %p162_p1, %p159_p0 }
   0x9   :  { %167 = shalt.err (!%p164_p2)
}
   0xa   :  { %s168_s20 = scalar_lea.vmem %s17_s10, 256  ;;  %p173_p4 = scmp.lt.s32.totalorder %s17_s10, %s17_s10 }
   0xb   :  { %p169_p3 = scmp.ne.s32.totalorder %s17_s10, %s168_s20  ;;  %p174_p5 = scmp.lt.s32.totalorder %s168_s20, %s168_s20 }
   0xd   :  { %p175_p6 = por %p174_p5, %p173_p4 }
   0xf   :  { %p176_p7 = pnand %p175_p6, %p169_p3 }
  0x11   :  { %179 = shalt.err (!%p176_p7)
}
  0x12   :  { %19 = dma.hbm_to_vmem [thread:$0]  %s296_s0, 256, %s17_s10, [#allocation3]  }
  0x13   :  { %s180_s25 = scalar_lea.hbm %s297_s1, 1024 }
  0x14   :  { %p181_p8 = scmp.ne.s32.totalorder %s297_s1, %s180_s25  ;;  %p184_p9 = scmp.lt.u32.totalorder %s180_s25, %s297_s1 }
  0x16   :  { %p186_p10 = pnand %p184_p9, %p181_p8 }
  0x18   :  { %189 = shalt.err (!%p186_p10)
}
  0x19   :  { %s190_s30 = scalar_lea.vmem %s251_s12, 1024  ;;  %p195_p12 = scmp.lt.s32.totalorder %s251_s12, %s251_s12 }
  0x1a   :  { %p191_p11 = scmp.ne.s32.totalorder %s251_s12, %s190_s30  ;;  %p196_p13 = scmp.lt.s32.totalorder %s190_s30, %s190_s30 }
  0x1c   :  { %p197_p0 = por %p196_p13, %p195_p12 }
  0x1e   :  { %p198_p1 = pnand %p197_p0, %p191_p11 }
  0x20   :  { %201 = shalt.err (!%p198_p1)
}
  0x21   :  { %s232_s0 = smov 256   ;;  %s233_s3 = smov 16  }
  0x22   :  { %31 = dma.hbm_to_vmem [thread:$0]  %s297_s1, 1024, %s251_s12, [#allocation6], %s232_s0, %s232_s0, %s233_s3  }
  0x23   :  { %224 = dma.done.wait [#allocation3], 256  }
  0x24   :  { %225 = vsyncadd [#allocation3], 4294967040 }
  0x25   :  { %226 = dma.done.wait [#allocation6], 1024  }
  0x26   :  { %227 = vsyncadd [#allocation6], 4294966272  ;;  %vm42_vm0 = vcmask 261120   ;;  %v234_v0 = vmov 0.0   ;;  %v48_v1 = vld [vmem:[#allocation5 + $0x8] sm:$0xff]  ;;  %v50_v2 = vld [vmem:[#allocation5 + $0x18] sm:$0xff] }
  0x27   :  { %43 = vst.msk [vmem:[#allocation7] sm:$0xff] %vm42_vm0, %v234_v0  ;;  %v47_v3 = vld [vmem:[#allocation5] sm:$0xff]  ;;  %v144_v4 = vpack.c.bf16 %v50_v2, %v48_v1  ;;  %v49_v5 = vld [vmem:[#allocation5 + $0x10] sm:$0xff]  ;;  %v52_v6 = vld [vmem:[#allocation5 + $0x28] sm:$0xff]  ;;  %s235_s1 = smov [#allocation7]  }
  0x28   :  { %v54_v7 = vld [vmem:[#allocation5 + $0x38] sm:$0xff]  ;;  %v146_v8 = vpack.c.bf16 %v49_v5, %v47_v3  ;;  %v51_v11 = vld [vmem:[#allocation5 + $0x20] sm:$0xff]  ;;  %v53_v12 = vld [vmem:[#allocation5 + $0x30] sm:$0xff]  ;;  %s134_s6 = sshll.u32 %s235_s1, 4  ;;  %s135_s6 = int_to_ptr.vmem [resolvable:$true] %s134_s6 }
  0x29   :  { %v148_v9 = vpack.c.bf16 %v54_v7, %v52_v6  ;;  %v45_v10 = vld [vmem:[#allocation2 + $0x8] sm:$0xff]  ;;  %145 = vmatprep.subr.bf16.mxu0 %v144_v4  ;;  %v150_v13 = vpack.c.bf16 %v53_v12, %v51_v11  ;;  %v44_v14 = vld [vmem:[#allocation2] sm:$0xff]  ;;  %s202_s7 = scalar_lea.vmem %s135_s6, 128  ;;  %p207_p3 = scmp.lt.s32.totalorder %s135_s6, %s135_s6 }
  0x2a   :  { %119 = vmatprep.mubr.f32.mxu0 %v45_v10  ;;  %147 = vmatpush1.bf16.xpose.msra.mxu0 %v146_v8  ;;  %p203_p2 = scmp.ne.s32.totalorder %s135_s6, %s202_s7  ;;  %p208_p4 = scmp.lt.s32.totalorder %s202_s7, %s202_s7 }
  0x2b   :  { %149 = vmatprep.subr.bf16.mxu0 %v148_v9 }
  0x2c   :  { %p209_p5 = por %p208_p4, %p207_p3 }
  0x2e   :  { %v46_v15 = vld [vmem:[#allocation7] sm:$0xff]  ;;  %p210_p6 = pnand %p209_p5, %p203_p2 }
  0x32   :  { %151 = vmatpush1.bf16.xpose.msra.mxu0 %v150_v13 }
  0x39   :  { %120 = vmatmul.mubr.f32.vlgmr.msra.gmra.mrb[0].mxu0 %v44_v14 }
 0x10c   :  { %v121_v16 = vpop.f32.mrb[0].mxu0 }
 0x10d   :  { %v125_v17 = vadd.f32 %v121_v16, %v46_v15  ;;  %v123_v18 = vpop.f32.mrb[1].mxu0 }
 0x10f   :  { %127 = vst.msk [vmem:[#allocation7] sm:$0xff] %vm42_vm0, %v125_v17 }
 0x110   :  { %213 = shalt.err (!%p210_p6)
}
 0x111   :  { %s214_s10 = scalar_lea.hbm %s298_s2, 128 }
 0x112   :  { %p215_p7 = scmp.ne.s32.totalorder %s298_s2, %s214_s10  ;;  %p218_p8 = scmp.lt.u32.totalorder %s214_s10, %s298_s2 }
 0x114   :  { %p220_p9 = pnand %p218_p8, %p215_p7 }
 0x116   :  { %223 = shalt.err (!%p220_p9)
}
 0x117   :  { %137 = dma.vmem_to_hbm [thread:$0]  %s135_s6, 128, %s298_s2, [#allocation4]  }
 0x118   :  { %228 = dma.done.wait [#allocation4], 128  }
 0x119   :  { %229 = vsyncadd [#allocation4], 4294967168 }
 0x11a   :  { %141 = vsyncpa [#allocation3], 1 }
 0x11b   :  { %142 = vsyncpa [#allocation6], 1 }
 0x11c   :  { %143 = vsyncpa [#allocation4], 1 }

</bundles_post_ra>
